<compile_context>
chip_gen: v7x
topology: tpu7x:2x2x1
jax: 0.10.0
libtpu: 0.0.40
codegen_flags: <defaults>
</compile_context>

<pallas_src>
import functools
import math

import jax
import jax.numpy as jnp
from jax.experimental import pallas as pl
from jax.experimental.pallas import tpu as pltpu


def _combined_loss_kernel(scalars_ref, labels_ref, logits_ref, den_ref, tgt_ref, acc_ref,
                          *, rows, tile_r, tiles_per_part, need_mask):
    # scalars_ref (SMEM f32[2]): [lambda_denoise / n_img_elems, lambda_classify / batch]
    p = pl.program_id(0)                       # part (TensorCore) index
    i = pl.program_id(1)                       # reduction step within this part
    last = pl.num_programs(1) - 1
    cols = den_ref.shape[1]

    @pl.when(i == 0)
    def _init():
        acc_ref[...] = jnp.zeros_like(acc_ref)

    # ---- MSE partial: squared error of this (tile_r, cols) block folded into the resident
    #      (8, cols) f32 accumulator.  The reshape only regroups whole sublane groups of 8,
    #      so the axis-0 sum is pure VPU vreg adds (no cross-lane traffic).
    diff = den_ref[...].astype(jnp.float32) - tgt_ref[...].astype(jnp.float32)
    sq = diff * diff
    if need_mask:
        # Ragged tail: rows past the logical array bound are undefined -> zero them first.
        start = (p * tiles_per_part + i) * tile_r
        rid = jax.lax.broadcasted_iota(jnp.int32, (tile_r, cols), 0)
        sq = jnp.where(start + rid < rows, sq, 0.0)
    acc_ref[...] += sq.reshape(tile_r // 8, 8, cols).sum(axis=0)

    # ---- Finalize MSE scaling once per part: (lambda_denoise / n), folded on the host.
    @pl.when(i == last)
    def _scale():
        acc_ref[...] = acc_ref[...] * scalars_ref[0]

    # ---- Cross-entropy: computed exactly once (part 0, last step) from tiny resident blocks
    #      (constant index_map -> fetched once, no per-step refetch/recompute).
    @pl.when(jnp.logical_and(i == last, p == 0))
    def _ce():
        logits = logits_ref[...].astype(jnp.float32)            # (B, NC)
        labels = labels_ref[...]                                 # (B, 1) int32
        row_max = jnp.max(logits, axis=-1, keepdims=True)
        lse = jnp.log(jnp.sum(jnp.exp(logits - row_max), axis=-1, keepdims=True)) + row_max
        class_ids = jax.lax.broadcasted_iota(jnp.int32, logits.shape, 1)
        onehot = (class_ids == labels).astype(jnp.float32)
        picked = jnp.sum(logits * onehot, axis=-1, keepdims=True)
        ce_term = scalars_ref[1] * jnp.sum(lse - picked)         # (lambda_classify/B) * sum(nll)
        # Add the CE scalar into element [0, 0] of the accumulator block via a masked vector add.
        rid2 = jax.lax.broadcasted_iota(jnp.int32, acc_ref.shape, 0)
        cid2 = jax.lax.broadcasted_iota(jnp.int32, acc_ref.shape, 1)
        is_first = jnp.logical_and(rid2 == 0, cid2 == 0)
        acc_ref[...] = acc_ref[...] + jnp.where(is_first, ce_term, 0.0)


def _chip_defaults():
    """Trace-time per-generation tuning.

    Returns (target_block_bytes_per_input, vmem_limit_bytes, max_parts, use_core_parallel).
    """
    kind = ""
    try:
        kind = jax.devices()[0].device_kind.lower()
    except Exception:
        pass
    if "v7" in kind:
        # 64 MiB physical VMEM, 3.2 TB/s HBM, 2 TensorCores: 4 MiB blocks (16 MiB double-
        # buffered across 2 inputs) keep the 0.35us step overhead ~10% with headroom to spare;
        # the 2-TC split is real bandwidth here.
        return 4 << 20, 32 << 20, 2, True
    if "v6" in kind:
        # 128 MiB VMEM, 1 TC: 4 MiB blocks, generous scoped-VMEM ceiling.
        return 4 << 20, 64 << 20, 1, False
    if "v5" in kind:
        # Slower HBM (~0.82 TB/s): 2 MiB blocks already reach roofline; default scoped VMEM
        # is only 16 MiB so the explicit 32 MiB limit matters.
        return 2 << 20, 32 << 20, 1, False
    # Unknown chip: conservative.
    return 2 << 20, 32 << 20, 1, False


def _pick_cols(n):
    """Largest multiple-of-128 column count that exactly divides n with >= 8 rows."""
    for c in (2048, 1024, 512, 256, 128):
        if n % c == 0 and n // c >= 8:
            return c
    return None


def combined_loss(denoising_output, target_images, classification_output, target_labels,
                  lambda_denoise=1.0, lambda_classify=1.0):
    n = math.prod(denoising_output.shape)
    B, NC = classification_output.shape
    itemsize = jnp.dtype(denoising_output.dtype).itemsize

    target_block_bytes, vmem_limit, max_parts, core_parallel = _chip_defaults()

    # Row-major flatten (free bitcast under the default layout).  No padding on the hot path.
    den_flat = denoising_output.reshape(-1)
    tgt_flat = target_images.reshape(-1)

    cols = _pick_cols(n)
    if cols is None:
        # TODO(synk): inputs whose element count is tiny or not a multiple of 128 fall back to a
        # padded copy (one extra HBM pass).  Padded zeros contribute nothing to the squared error.
        cols = 128
        rows = -(-max(n, 8 * cols) // cols)
        rows = -(-rows // 8) * 8
        pad = rows * cols - n
        den_flat = jnp.pad(den_flat, (0, pad))
        tgt_flat = jnp.pad(tgt_flat, (0, pad))
    else:
        rows = n // cols

    den2 = den_flat.reshape(rows, cols)        # native dtype; the f32 upcast happens in-kernel
    tgt2 = tgt_flat.reshape(rows, cols)

    # Dtype-aware block sizing: target `target_block_bytes` of HBM traffic per input per step
    # (bf16/fp8 inputs therefore get proportionally taller tiles for the same byte count).
    tile_r = max(8, (target_block_bytes // (cols * itemsize)) // 8 * 8)
    tile_r = min(tile_r, (rows // 8) * 8)

    total_tiles = -(-rows // tile_r)
    num_parts = max_parts if total_tiles >= max_parts else 1
    tiles_per_part = -(-total_tiles // num_parts)
    covered_rows = num_parts * tiles_per_part * tile_r
    need_mask = covered_rows > rows            # ragged tail handled in-kernel, never via pad
    last_block = total_tiles - 1
    clamp_blocks = num_parts * tiles_per_part > total_tiles

    def io_map(p, i):
        b = p * tiles_per_part + i
        if clamp_blocks:
            # Keep the DMA in-bounds; the duplicated tail block is fully masked in-kernel.
            b = jnp.minimum(b, last_block)
        return (b, 0)

    labels = target_labels.astype(jnp.int32).reshape(B, 1)
    # lambda / (1/N) products folded on the host -> changing weights never retraces the kernel.
    scalars = jnp.array([lambda_denoise / n, lambda_classify / B], dtype=jnp.float32)

    if core_parallel and num_parts > 1:
        # Real 2-TensorCore split (v7x only): plain "parallel" does not change sharding.
        dim_sem = (getattr(pltpu, "CORE_PARALLEL", "parallel"),
                   getattr(pltpu, "ARBITRARY", "arbitrary"))
    else:
        dim_sem = ("arbitrary", "arbitrary")

    kernel = functools.partial(
        _combined_loss_kernel,
        rows=rows, tile_r=tile_r, tiles_per_part=tiles_per_part, need_mask=need_mask)

    acc = pl.pallas_call(
        kernel,
        out_shape=jax.ShapeDtypeStruct((num_parts * 8, cols), jnp.float32),
        grid=(num_parts, tiles_per_part),
        in_specs=[
            pl.BlockSpec(memory_space=pltpu.MemorySpace.SMEM),             # folded loss weights
            pl.BlockSpec((B, 1), lambda p, i: (0, 0)),                     # labels (resident)
            pl.BlockSpec((B, NC), lambda p, i: (0, 0)),                    # logits (resident)
            pl.BlockSpec((tile_r, cols), io_map),                          # denoising output
            pl.BlockSpec((tile_r, cols), io_map),                          # target images
        ],
        out_specs=pl.BlockSpec((8, cols), lambda p, i: (p, 0)),            # per-part accumulator
        compiler_params=pltpu.CompilerParams(
            dimension_semantics=dim_sem,
            vmem_limit_bytes=vmem_limit,
        ),
        cost_estimate=pl.CostEstimate(
            flops=int(3 * n + 5 * B * NC),
            transcendentals=int(B * NC + B),
            bytes_accessed=int(2 * n * itemsize + B * NC * 4 + B * 4 + num_parts * 8 * cols * 4),
        ),
    )(scalars, labels, classification_output, den2, tgt2)

    # Tiny cross-part / cross-lane reduce of the already-scaled partials.
    return jnp.sum(acc)


def _reference_loss(den, tgt, logits, labels, lambda_denoise=1.0, lambda_classify=1.0):
    mse = jnp.mean((den.astype(jnp.float32) - tgt.astype(jnp.float32)) ** 2)
    lg = logits.astype(jnp.float32)
    logz = jax.scipy.special.logsumexp(lg, axis=-1)
    nll = logz - jnp.take_along_axis(lg, labels[:, None], axis=-1)[:, 0]
    ce = jnp.mean(nll)
    return lambda_denoise * mse + lambda_classify * ce


if __name__ == "__main__":
    key = jax.random.PRNGKey(0)
    k1, k2, k3, k4 = jax.random.split(key, 4)

    B, C, H, W = 2, 4, 16, 16
    NUM_CLASSES = 10

    denoising_output = jax.random.normal(k1, (B, C, H, W), dtype=jnp.float32)
    target_images = jax.random.normal(k2, (B, C, H, W), dtype=jnp.float32)
    classification_output = jax.random.normal(k3, (B, NUM_CLASSES), dtype=jnp.float32)
    target_labels = jax.random.randint(k4, (B,), 0, NUM_CLASSES, dtype=jnp.int32)

    total = combined_loss(denoising_output, target_images,
                          classification_output, target_labels,
                          lambda_denoise=1.0, lambda_classify=1.0)
    total = jax.block_until_ready(total)

    ref = _reference_loss(denoising_output, target_images,
                          classification_output, target_labels)
    assert jnp.allclose(total, ref, rtol=1e-4, atol=1e-4), (total, ref)

    print("KERNEL_OK")
</pallas_src>

<mosaic_0001>
module attributes {stable_mosaic.version = 11 : i64} {
  func.func @_combined_loss_kernel(%arg0: i32, %arg1: i32, %arg2: memref<2xf32, #tpu.memory_space<smem>>, %arg3: memref<2x1xi32, #tpu.memory_space<vmem>>, %arg4: memref<2x10xf32, #tpu.memory_space<vmem>>, %arg5: memref<8x256xf32, #tpu.memory_space<vmem>>, %arg6: memref<8x256xf32, #tpu.memory_space<vmem>>, %arg7: memref<8x256xf32, #tpu.memory_space<vmem>>) attributes {dimension_semantics = [#tpu.dimension_semantics<arbitrary>, #tpu.dimension_semantics<arbitrary>], iteration_bounds = array<i64: 1, 1>, scalar_prefetch = 0 : i64, scratch_operands = 0 : i64, tpu.core_type = #tpu.core_type<tc>, window_params = [{transform_indices = @transform_0, window_bounds = array<i64: 2>}, {pipeline_mode = #tpu.pipeline_mode<synchronous>, transform_indices = @transform_1, window_bounds = array<i64: 2, 1>}, {pipeline_mode = #tpu.pipeline_mode<synchronous>, transform_indices = @transform_2, window_bounds = array<i64: 2, 10>}, {transform_indices = @transform_3, window_bounds = array<i64: 8, 256>}, {transform_indices = @transform_4, window_bounds = array<i64: 8, 256>}, {transform_indices = @transform_5, window_bounds = array<i64: 8, 256>}]} {
    %c0_i32 = arith.constant 0 : i32
    %0 = arith.cmpi eq, %arg1, %c0_i32 : i32
    %1 = arith.extui %0 : i1 to i32
    %c0_i32_0 = arith.constant 0 : i32
    %2 = arith.cmpi ne, %1, %c0_i32_0 : i32
    scf.if %2 {
      %cst_13 = arith.constant 0.000000e+00 : f32
      %20 = vector.broadcast %cst_13 : f32 to vector<8x256xf32>
      %c0_14 = arith.constant 0 : index
      %c0_15 = arith.constant 0 : index
      %21 = vector.load %arg7[%c0_14, %c0_15] : memref<8x256xf32, #tpu.memory_space<vmem>>, vector<8x256xf32>
      tpu.vector_store %arg7[%c0_14, %c0_15], %20 {strides = array<i32>} : memref<8x256xf32, #tpu.memory_space<vmem>>, vector<8x256xf32>,
    } else {
    }
    %c0 = arith.constant 0 : index
    %c0_1 = arith.constant 0 : index
    %3 = vector.load %arg5[%c0, %c0_1] : memref<8x256xf32, #tpu.memory_space<vmem>>, vector<8x256xf32>
    %c0_2 = arith.constant 0 : index
    %c0_3 = arith.constant 0 : index
    %4 = vector.load %arg6[%c0_2, %c0_3] : memref<8x256xf32, #tpu.memory_space<vmem>>, vector<8x256xf32>
    %5 = arith.subf %3, %4 : vector<8x256xf32>
    %6 = arith.mulf %5, %5 : vector<8x256xf32>
    %c0_4 = arith.constant 0 : index
    %c0_5 = arith.constant 0 : index
    %7 = vector.load %arg7[%c0_4, %c0_5] : memref<8x256xf32, #tpu.memory_space<vmem>>, vector<8x256xf32>
    %8 = vector.shape_cast %6 : vector<8x256xf32> to vector<1x8x256xf32>
    %cst = arith.constant dense<0.000000e+00> : vector<8x256xf32>
    %9 = vector.multi_reduction <add>, %8, %cst [0] : vector<1x8x256xf32> to vector<8x256xf32>
    %10 = arith.addf %7, %9 : vector<8x256xf32>
    %c0_6 = arith.constant 0 : index
    %c0_7 = arith.constant 0 : index
    %11 = vector.load %arg7[%c0_6, %c0_7] : memref<8x256xf32, #tpu.memory_space<vmem>>, vector<8x256xf32>
    tpu.vector_store %arg7[%c0_6, %c0_7], %10 {strides = array<i32>} : memref<8x256xf32, #tpu.memory_space<vmem>>, vector<8x256xf32>,
    %c0_i32_8 = arith.constant 0 : i32
    %12 = arith.cmpi eq, %arg1, %c0_i32_8 : i32
    %13 = arith.extui %12 : i1 to i32
    %c0_i32_9 = arith.constant 0 : i32
    %14 = arith.cmpi ne, %13, %c0_i32_9 : i32
    scf.if %14 {
      %c0_13 = arith.constant 0 : index
      %c0_14 = arith.constant 0 : index
      %20 = vector.load %arg7[%c0_13, %c0_14] : memref<8x256xf32, #tpu.memory_space<vmem>>, vector<8x256xf32>
      %c0_15 = arith.constant 0 : index
      %21 = memref.load %arg2[%c0_15] : memref<2xf32, #tpu.memory_space<smem>>
      %22 = vector.broadcast %21 : f32 to vector<8x256xf32>
      %23 = arith.mulf %20, %22 : vector<8x256xf32>
      %c0_16 = arith.constant 0 : index
      %c0_17 = arith.constant 0 : index
      %24 = vector.load %arg7[%c0_16, %c0_17] : memref<8x256xf32, #tpu.memory_space<vmem>>, vector<8x256xf32>
      tpu.vector_store %arg7[%c0_16, %c0_17], %23 {strides = array<i32>} : memref<8x256xf32, #tpu.memory_space<vmem>>, vector<8x256xf32>,
    } else {
    }
    %c0_i32_10 = arith.constant 0 : i32
    %15 = arith.cmpi eq, %arg1, %c0_i32_10 : i32
    %c0_i32_11 = arith.constant 0 : i32
    %16 = arith.cmpi eq, %arg0, %c0_i32_11 : i32
    %17 = arith.andi %15, %16 : i1
    %18 = arith.extui %17 : i1 to i32
    %c0_i32_12 = arith.constant 0 : i32
    %19 = arith.cmpi ne, %18, %c0_i32_12 : i32
    scf.if %19 {
      %c0_13 = arith.constant 0 : index
      %c0_14 = arith.constant 0 : index
      %20 = vector.load %arg4[%c0_13, %c0_14] : memref<2x10xf32, #tpu.memory_space<vmem>>, vector<2x10xf32>
      %c0_15 = arith.constant 0 : index
      %c0_16 = arith.constant 0 : index
      %21 = vector.load %arg3[%c0_15, %c0_16] : memref<2x1xi32, #tpu.memory_space<vmem>>, vector<2x1xi32>
      %cst_17 = arith.constant dense<0xFF800000> : vector<2xf32>
      %22 = vector.multi_reduction <maximumf>, %20, %cst_17 [1] : vector<2x10xf32> to vector<2xf32>
      %23 = vector.shape_cast %22 : vector<2xf32> to vector<2x1xf32>
      %24 = vector.broadcast %23 : vector<2x1xf32> to vector<2x10xf32>
      %25 = arith.subf %20, %24 : vector<2x10xf32>
      %26 = math.exp %25 : vector<2x10xf32>
      %cst_18 = arith.constant dense<0.000000e+00> : vector<2xf32>
      %27 = vector.multi_reduction <add>, %26, %cst_18 [1] : vector<2x10xf32> to vector<2xf32>
      %28 = vector.shape_cast %27 : vector<2xf32> to vector<2x1xf32>
      %29 = math.log %28 : vector<2x1xf32>
      %30 = arith.addf %29, %23 : vector<2x1xf32>
      %31 = tpu.iota {dimensions = array<i32: 1>} : vector<2x10xi32>
      %32 = vector.broadcast %21 : vector<2x1xi32> to vector<2x10xi32>
      %33 = arith.cmpi eq, %31, %32 : vector<2x10xi32>
      %34 = arith.extui %33 : vector<2x10xi1> to vector<2x10xi32>
      %35 = arith.sitofp %34 : vector<2x10xi32> to vector<2x10xf32>
      %36 = arith.mulf %20, %35 : vector<2x10xf32>
      %cst_19 = arith.constant dense<0.000000e+00> : vector<2xf32>
      %37 = vector.multi_reduction <add>, %36, %cst_19 [1] : vector<2x10xf32> to vector<2xf32>
      %38 = vector.shape_cast %37 : vector<2xf32> to vector<2x1xf32>
      %c1 = arith.constant 1 : index
      %39 = memref.load %arg2[%c1] : memref<2xf32, #tpu.memory_space<smem>>
      %40 = arith.subf %30, %38 : vector<2x1xf32>
      %41 = vector.shape_cast %40 : vector<2x1xf32> to vector<1x2x1xf32>
      %cst_20 = arith.constant dense<0.000000e+00> : vector<1xf32>
      %42 = vector.multi_reduction <add>, %41, %cst_20 [1, 2] : vector<1x2x1xf32> to vector<1xf32>
      %43 = vector.shape_cast %42 : vector<1xf32> to vector<1x1x1xf32>
      %44 = vector.extract %43[0, 0, 0] : f32 from vector<1x1x1xf32>
      %45 = arith.mulf %39, %44 : f32
      %46 = tpu.iota {dimensions = array<i32: 0>} : vector<8x256xi32>
      %47 = tpu.iota {dimensions = array<i32: 1>} : vector<8x256xi32>
      %c0_i32_21 = arith.constant 0 : i32
      %48 = vector.broadcast %c0_i32_21 : i32 to vector<8x256xi32>
      %49 = arith.cmpi eq, %46, %48 : vector<8x256xi32>
      %c0_i32_22 = arith.constant 0 : i32
      %50 = vector.broadcast %c0_i32_22 : i32 to vector<8x256xi32>
      %51 = arith.cmpi eq, %47, %50 : vector<8x256xi32>
      %52 = arith.andi %49, %51 : vector<8x256xi1>
      %c0_23 = arith.constant 0 : index
      %c0_24 = arith.constant 0 : index
      %53 = vector.load %arg7[%c0_23, %c0_24] : memref<8x256xf32, #tpu.memory_space<vmem>>, vector<8x256xf32>
      %cst_25 = arith.constant 0.000000e+00 : f32
      %54 = vector.broadcast %45 : f32 to vector<8x256xf32>
      %55 = vector.broadcast %cst_25 : f32 to vector<8x256xf32>
      %56 = arith.select %52, %54, %55 : vector<8x256xi1>, vector<8x256xf32>
      %57 = arith.addf %53, %56 : vector<8x256xf32>
      %c0_26 = arith.constant 0 : index
      %c0_27 = arith.constant 0 : index
      %58 = vector.load %arg7[%c0_26, %c0_27] : memref<8x256xf32, #tpu.memory_space<vmem>>, vector<8x256xf32>
      tpu.vector_store %arg7[%c0_26, %c0_27], %57 {strides = array<i32>} : memref<8x256xf32, #tpu.memory_space<vmem>>, vector<8x256xf32>,
    } else {
    }
    return
  }
  func.func @transform_0(%arg0: i32, %arg1: i32) -> i32 {
    %c0_i32 = arith.constant 0 : i32
    %c0_i32_0 = arith.constant 0 : i32
    return %c0_i32 : i32
  }
  func.func @transform_1(%arg0: i32, %arg1: i32) -> (i32, i32) {
    %c0_i32 = arith.constant 0 : i32
    %c0_i32_0 = arith.constant 0 : i32
    %c0_i32_1 = arith.constant 0 : i32
    return %c0_i32, %c0_i32_0 : i32, i32
  }
  func.func @transform_2(%arg0: i32, %arg1: i32) -> (i32, i32) {
    %c0_i32 = arith.constant 0 : i32
    %c0_i32_0 = arith.constant 0 : i32
    %c0_i32_1 = arith.constant 0 : i32
    return %c0_i32, %c0_i32_0 : i32, i32
  }
  func.func @transform_3(%arg0: i32, %arg1: i32) -> (i32, i32) {
    %c1_i32 = arith.constant 1 : i32
    %0 = arith.muli %arg0, %c1_i32 : i32
    %1 = arith.addi %0, %arg1 : i32
    %c0_i32 = arith.constant 0 : i32
    %c0_i32_0 = arith.constant 0 : i32
    return %1, %c0_i32 : i32, i32
  }
  func.func @transform_4(%arg0: i32, %arg1: i32) -> (i32, i32) {
    %c1_i32 = arith.constant 1 : i32
    %0 = arith.muli %arg0, %c1_i32 : i32
    %1 = arith.addi %0, %arg1 : i32
    %c0_i32 = arith.constant 0 : i32
    %c0_i32_0 = arith.constant 0 : i32
    return %1, %c0_i32 : i32, i32
  }
  func.func @transform_5(%arg0: i32, %arg1: i32) -> (i32, i32) {
    %c0_i32 = arith.constant 0 : i32
    %c0_i32_0 = arith.constant 0 : i32
    return %arg0, %c0_i32 : i32, i32
  }
}

</mosaic_0001>

<bundles_post_ra>
// kernel: tpu_custom_call.1
= control target key start
LH: loop header
LB: loop body
LE: loop exit
PB: predicated region body
PF: predicated region fallthrough
CT: control target
= control target key end

     0   :  { %10 = vsyncpa [#allocation5], 0  ;;  %s347_s0 = inlined_call_operand.hbm [shape: f32[2], index: 0, kind: input, shape index: {}]   ;;  %s348_s1 = inlined_call_operand.vmem [shape: s32[2,1], index: 1, kind: input, shape index: {}]   ;;  %s349_s2 = inlined_call_operand.vmem [shape: f32[2,10], index: 2, kind: input, shape index: {}]   ;;  %s350_s3 = inlined_call_operand.hbm [shape: f32[8,256], index: 3, kind: input, shape index: {}]   ;;  %s351_s4 = inlined_call_operand.vmem [shape: f32[8,256], index: 4, kind: input, shape index: {}]   ;;  %s352_s5 = inlined_call_operand.hbm [shape: f32[8,256], index: 5, kind: output, shape index: {}]  }
   0x1   :  { %11 = vsyncpa [#allocation3], 0 }
   0x2   :  { %12 = vsyncpa [#allocation4], 0  ;;  %s201_s20 = scalar_lea.hbm %s347_s0, 16 }
   0x3   :  { %p202_p0 = scmp.ne.s32.totalorder %s347_s0, %s201_s20  ;;  %p205_p1 = scmp.lt.u32.totalorder %s201_s20, %s347_s0 }
   0x5   :  { %p207_p2 = pnand %p205_p1, %p202_p0 }
   0x7   :  { %210 = shalt.err (!%p207_p2)
}
   0x8   :  { %s261_s25 = smov [#allocation2]   ;;  %s262_s28 = smov [#allocation6]  }
   0x9   :  { %20 = dma.hbm_to_smem %s347_s0, 16, %s261_s25, [#allocation5]  }
   0xa   :  { %s35_s29 = sshll.u32 %s262_s28, 4  ;;  %s211_s7 = scalar_lea.hbm %s350_s3, 256  ;;  %s36_s29 = int_to_ptr.vmem [resolvable:$true] %s35_s29 }
   0xb   :  { %p212_p3 = scmp.ne.s32.totalorder %s350_s3, %s211_s7  ;;  %p215_p4 = scmp.lt.u32.totalorder %s211_s7, %s350_s3 }
   0xd   :  { %p217_p5 = pnand %p215_p4, %p212_p3 }
   0xf   :  { %220 = shalt.err (!%p217_p5)
}
  0x10   :  { %s221_s12 = scalar_lea.vmem %s36_s29, 256  ;;  %p226_p7 = scmp.lt.s32.totalorder %s36_s29, %s36_s29 }
  0x11   :  { %p222_p6 = scmp.ne.s32.totalorder %s36_s29, %s221_s12  ;;  %p227_p8 = scmp.lt.s32.totalorder %s221_s12, %s221_s12 }
  0x13   :  { %p228_p9 = por %p227_p8, %p226_p7 }
  0x15   :  { %p229_p10 = pnand %p228_p9, %p222_p6 }
  0x17   :  { %232 = shalt.err (!%p229_p10)
}
  0x18   :  { %38 = dma.hbm_to_vmem [thread:$0]  %s350_s3, 256, %s36_s29, [#allocation3]  }
  0x19   :  { %255 = dma.done.wait [#allocation5], 16  }
  0x1a   :  { %256 = vsyncadd [#allocation5], 4294967280 }
  0x1b   :  { %257 = dma.done.wait [#allocation3], 256  }
  0x1c   :  { %258 = vsyncadd [#allocation3], 4294967040 }
  0x1d   :  { %54 = sfence }
  0x1e   :  { %v107_v0 = vld [vmem:[%s349_s2] sm:$0x3]  ;;  %vm109_vm0 = vcmask 74752   ;;  %v263_v2 = vmov 0   ;;  %v122_v6 = vlaneseq  ;;  %v264_v10 = vmov 0.0   ;;  %v76_v23 = vld [vmem:[#allocation6 + $0x8] sm:$0xff] }
  0x1f   :  { %v110_v1 = vsel %vm109_vm0, %v107_v0, -inf  ;;  %196 = vset.pattern.permute.xlu0 %v263_v2  ;;  %v108_v3 = vld [vmem:[%s348_s1] sm:$0x3]  ;;  %vm136_vm2 = vcmask 1024   ;;  %s96_s1 = sld [smem:[#allocation2]]  ;;  %v78_v24 = vld [vmem:[%s351_s4 + $0x8] sm:$0xff] }
  0x20   :  { %111 = vmax.xlane.f32.xlu0 %v110_v1  ;;  %v123_v8 = vand.u32 127, %v122_v6  ;;  %v80_v25 = vsub.f32 %v76_v23, %v78_v24  ;;  %v75_v36 = vld [vmem:[#allocation6] sm:$0xff]  ;;  %s188_s20 = sld [smem:[#allocation2 + $0x1]]  ;;  %v149_v40 = vshrl.u32 %v122_v6, 7  ;;  %s265_s23 = smov [#allocation7]  }
  0x21   :  { %v77_v37 = vld [vmem:[%s351_s4] sm:$0xff]  ;;  %s171_s24 = sshll.u32 %s265_s23, 4  ;;  %s172_s24 = int_to_ptr.vmem [resolvable:$true] %s171_s24 }
  0x22   :  { %v82_v26 = vmul.f32 %v80_v25, %v80_v25  ;;  %v79_v38 = vsub.f32 %v75_v36, %v77_v37  ;;  %vm151_vm3 = vcmp.eq.s32.totalorder %v149_v40, 0  ;;  %vm152_vm4 = vcmp.eq.s32.totalorder %v123_v8, 0  ;;  %s233_s25 = scalar_lea.vmem %s172_s24, 256  ;;  %p238_p12 = scmp.lt.s32.totalorder %s172_s24, %s172_s24 }
  0x23   :  { %vm154_vm5 = vmand %vm151_vm3, %vm152_vm4  ;;  %p234_p11 = scmp.ne.s32.totalorder %s172_s24, %s233_s25  ;;  %p239_p13 = scmp.lt.s32.totalorder %s233_s25, %s233_s25 }
  0x24   :  { %v81_v39 = vmul.f32 %v79_v38, %v79_v38 }
  0x25   :  { %v97_v27 = vstv %s96_s1  ;;  %p240_p0 = por %p239_p13, %p238_p12 }
  0x26   :  { %v99_v28 = vmul.f32 %v97_v27, %v82_v26  ;;  %v98_v41 = vmul.f32 %v97_v27, %v81_v39 }
  0x27   :  { %p241_p1 = pnand %p240_p0, %p234_p11 }
  0x28   :  { %164 = vst [vmem:[#allocation7 + $0x8] sm:$0xff] %v99_v28 }
  0x36   :  { %125 = vperm.xlu0 %196, %v108_v3  }
  0xad   :  { %v112_v4 = vpop.xlane.xlu0 %111 }
  0xae   :  { %v113_v5 = vsub.f32 %v107_v0, %v112_v4 }
  0xb0   :  { %v114_v7 = vmul.f32 1.442695, %v113_v5 }
  0xb2   :  { %197 = vpow2.f32 %v114_v7 }
  0xb5   :  { %v126_v9 = vpop.permute.xlu0 %125 }
  0xb6   :  { %vm127_vm1 = vcmp.eq.s32.totalorder %v123_v8, %v126_v9 }
  0xb7   :  { %v187_v11 = vsel %vm127_vm1, 1.0, %v264_v10 }
  0xb8   :  { %v130_v12 = vmul.f32 %v187_v11, %v107_v0 }
  0xba   :  { %v131_v15 = vsel %vm109_vm0, %v130_v12, 0.0 }
  0xbc   :  { %v198_v13 = vpop.eup %197 }
  0xbd   :  { %v116_v14 = vsel %vm109_vm0, %v198_v13, 0.0 }
  0xbe   :  { %117 = vadd.xlane.f32.xlu1 %v116_v14 }
  0xc2   :  { %132 = vadd.xlane.f32.xlu1 %v131_v15 }
 0x14b   :  { %v118_v16 = vpop.xlane.xlu1 %117 }
 0x14c   :  { %199 = vlog2.f32 %v118_v16 }
 0x14f   :  { %v133_v19 = vpop.xlane.xlu1 %132 }
 0x156   :  { %v200_v17 = vpop.eup %199 }
 0x157   :  { %v120_v18 = vmul.f32 0.6931472, %v200_v17 }
 0x159   :  { %v121_v20 = vadd.f32 %v120_v18, %v112_v4 }
 0x15b   :  { %v135_v21 = vsub.f32 %v121_v20, %v133_v19 }
 0x15d   :  { %v137_v22 = vsel %vm136_vm2, %v135_v21, 0.0 }
 0x15e   :  { %138 = vadd.xlane.f32.xlu1 %v137_v22 }
 0x1eb   :  { %v139_v29 = vpop.xlane.xlu1 %138 }
 0x1ec   :  { %v140_v30 = vrot.slane %v139_v29, 4 }
 0x1ee   :  { %v141_v31 = vadd.f32 %v140_v30, %v139_v29 }
 0x1f0   :  { %v142_v32 = vrot.slane %v141_v31, 2 }
 0x1f2   :  { %v143_v33 = vadd.f32 %v142_v32, %v141_v31 }
 0x1f4   :  { %v144_v34 = vrot.slane %v143_v33, 1 }
 0x1f6   :  { %v145_v35 = vadd.f32 %v144_v34, %v143_v33 }
 0x1f8   :  { %189 = vpush %v145_v35 }
 0x229   :  { %s190_s21 = spop %189 }
 0x22a   :  { %s147_s22 = smul.f32 %s190_s21, %s188_s20 }
 0x22c   :  { %v158_v42 = vstv %s147_s22 }
 0x22d   :  { %v159_v43 = vsel %vm154_vm5, %v158_v42, 0.0 }
 0x22e   :  { %v161_v44 = vadd.f32 %v159_v43, %v98_v41 }
 0x230   :  { %163 = vst [vmem:[#allocation7] sm:$0xff] %v161_v44 }
 0x231   :  { %244 = shalt.err (!%p241_p1)
}
 0x232   :  { %s245_s27 = scalar_lea.hbm %s352_s5, 256 }
 0x233   :  { %p246_p2 = scmp.ne.s32.totalorder %s352_s5, %s245_s27  ;;  %p249_p3 = scmp.lt.u32.totalorder %s245_s27, %s352_s5 }
 0x235   :  { %p251_p4 = pnand %p249_p3, %p246_p2 }
 0x237   :  { %254 = shalt.err (!%p251_p4)
}
 0x238   :  { %174 = dma.vmem_to_hbm [thread:$0]  %s172_s24, 256, %s352_s5, [#allocation4]  }
 0x239   :  { %259 = dma.done.wait [#allocation4], 256  }
 0x23a   :  { %260 = vsyncadd [#allocation4], 4294967040 }
 0x23b   :  { %178 = vsyncpa [#allocation3], 1 }
 0x23c   :  { %179 = vsyncpa [#allocation4], 1 }
 0x23d   :  { %180 = vsyncpa [#allocation5], 1 }

</bundles_post_ra>
